<compile_context>
chip_gen: v7x
topology: tpu7x:2x2x1
jax: 0.10.0
libtpu: 0.0.40
codegen_flags: <defaults>
</compile_context>

<pallas_src>
import functools
import math

import jax
import jax.numpy as jnp
from jax.experimental import pallas as pl
from jax.experimental.pallas import tpu as pltpu


# ----------------------------------------------------------------------------
# Parameter setup (deterministic, mirrors AlibiPositionalBias._get_slopes)
# ----------------------------------------------------------------------------
def _get_slopes(heads):
    def get_slopes_power_of_2(n):
        start = 2 ** (-(2 ** (-(math.log2(n) - 3))))
        ratio = start
        return [start * ratio ** i for i in range(n)]

    if math.log2(heads).is_integer():
        return get_slopes_power_of_2(heads)
    closest_power_of_2 = 2 ** math.floor(math.log2(heads))
    return (
        get_slopes_power_of_2(closest_power_of_2)
        + get_slopes_power_of_2(2 * closest_power_of_2)[0::2][: heads - closest_power_of_2]
    )


def make_learned_logslopes(heads):
    slopes = jnp.asarray(_get_slopes(heads), dtype=jnp.float32)  # (H,)
    return jnp.log(slopes)  # learned parameter, (H,)


# ----------------------------------------------------------------------------
# Pallas kernel (tiled path)
# ----------------------------------------------------------------------------
def _alibi_tiled_kernel(neg_slopes_ref, out_ref, dist_ref, *, offset):
    # Grid: (row_tiles, col_tiles, heads); heads is innermost ("arbitrary").
    #   neg_slopes_ref : (H,) f32 in SMEM, holds -exp(logslopes).
    #   out_ref        : (1, TI, TJ) output block for head h, tile (ti, tj).
    #   dist_ref       : (1, TI, TJ) f32 VMEM scratch, persists across heads.
    ti = pl.program_id(0)
    tj = pl.program_id(1)
    h = pl.program_id(2)
    _, TI, TJ = dist_ref.shape

    @pl.when(h == 0)
    def _():
        # Fold all tile-base arithmetic into one scalar (free scalar slot):
        #   |c_global - r_global - offset| = |c_local - r_local + const|
        const = tj * TJ - ti * TI - offset
        col = jax.lax.broadcasted_iota(jnp.int32, (1, TI, TJ), 2)
        row = jax.lax.broadcasted_iota(jnp.int32, (1, TI, TJ), 1)
        dist_ref[...] = jnp.abs(col - row + const).astype(jnp.float32)

    # One multiply + store per element per head; dist slab reused across heads.
    out_ref[...] = (dist_ref[...] * neg_slopes_ref[h]).astype(out_ref.dtype)


# ----------------------------------------------------------------------------
# Tile-size selection
# ----------------------------------------------------------------------------
def _choose_tiles(i, j, block_budget_bytes):
    bpe = 4  # f32 scratch / output
    row_bytes = j * bpe
    if 8 * row_bytes <= block_budget_bytes:
        # Prefer full rows (TJ = j): contiguous, unmasked writeback.
        TJ = j
        max_ti = block_budget_bytes // row_bytes
        TI = i if i <= max_ti else max(8, (max_ti // 8) * 8)
    else:
        # j too wide even for 8 rows: split the column dimension instead.
        TI = i if i < 8 else 8
        max_tj = max(128, block_budget_bytes // (max(TI, 1) * bpe))
        TJ = max(128, (max_tj // 128) * 128)
        TJ = min(TJ, pl.cdiv(j, 128) * 128)

    # v7x megacore: ensure the parallel (ti, tj) grid has >= 2 blocks so both
    # TensorCores get work (heads stays "arbitrary" due to the scratch reuse).
    if pl.cdiv(i, TI) * pl.cdiv(j, TJ) == 1 and i > 8:
        TI = max(8, pl.cdiv(pl.cdiv(i, 2), 8) * 8)
    return TI, TJ


# ----------------------------------------------------------------------------
# Pure-JAX path (tiny outputs; also serves as the reference building block)
# ----------------------------------------------------------------------------
def _alibi_bias_jax(neg_slopes, i, j, out_dtype):
    rows = jnp.arange(j - i, j, dtype=jnp.int32)
    cols = jnp.arange(j, dtype=jnp.int32)
    dist = jnp.abs(cols[None, :] - rows[:, None]).astype(jnp.float32)  # (i, j)
    return (dist[None, :, :] * neg_slopes[:, None, None]).astype(out_dtype)


# ----------------------------------------------------------------------------
# Wrapper
# ----------------------------------------------------------------------------
def learned_alibi_positional_bias(
    logslopes,
    i,
    j,
    *,
    block_budget_bytes=8 << 20,   # ~8 MiB per output block (review suggestion)
    jax_fallback_bytes=2 << 20,   # tiny outputs: launch-overhead dominated
    out_dtype=jnp.float32,        # bf16 halves writeback bytes if tolerated
):
    """Returns bias of shape (heads, i, j)."""
    heads = logslopes.shape[0]
    # Hoist exp + negation out of the per-tile path (tiny (H,) op in XLA).
    neg_slopes = -jnp.exp(logslopes).astype(jnp.float32)
    offset = j - i

    out_bpe = jnp.dtype(out_dtype).itemsize
    out_bytes = out_bpe * heads * i * j
    if out_bytes <= jax_fallback_bytes:
        # Too small for a custom call to pay off; XLA fuses this for free.
        return _alibi_bias_jax(neg_slopes, i, j, out_dtype)

    TI, TJ = _choose_tiles(i, j, block_budget_bytes)
    grid = (pl.cdiv(i, TI), pl.cdiv(j, TJ), heads)

    # 2 double-buffered output blocks + 1 dist scratch block (+ headroom).
    block_bytes = TI * TJ * 4
    vmem_limit = max(3 * block_bytes + (4 << 20), 16 << 20)

    cost = pl.CostEstimate(
        flops=heads * i * j + 4 * i * j,  # per-head mul + amortized dist work
        transcendentals=0,                # exp hoisted to wrapper
        bytes_accessed=out_bytes + 4 * heads,
    )

    return pl.pallas_call(
        functools.partial(_alibi_tiled_kernel, offset=offset),
        out_shape=jax.ShapeDtypeStruct((heads, i, j), out_dtype),
        grid=grid,
        in_specs=[pl.BlockSpec(memory_space=pltpu.SMEM)],
        out_specs=pl.BlockSpec((1, TI, TJ), lambda ti, tj, h: (h, ti, tj)),
        scratch_shapes=[pltpu.VMEM((1, TI, TJ), jnp.float32)],
        compiler_params=pltpu.CompilerParams(
            dimension_semantics=("parallel", "parallel", "arbitrary"),
            vmem_limit_bytes=vmem_limit,
        ),
        cost_estimate=cost,
    )(neg_slopes)


# ----------------------------------------------------------------------------
# Pure-JAX reference (mirrors the PyTorch forward)
# ----------------------------------------------------------------------------
def reference(logslopes, i, j):
    i_arange = jnp.arange(j - i, j, dtype=jnp.float32)
    j_arange = jnp.arange(j, dtype=jnp.float32)
    bias = -jnp.abs(j_arange[None, None, :] - i_arange[None, :, None])  # (1,i,j)
    slopes = jnp.exp(logslopes)[:, None, None]  # (H,1,1)
    return bias * slopes  # (H,i,j)


if __name__ == "__main__":
    heads = 4
    total_heads = 8  # unused in the learned forward (pad amount is 0)

    # Deterministic parameter init (ALiBi slope formula) + tiny perturbation
    # from PRNGKey(0) standing in for "learned" updates.
    key = jax.random.PRNGKey(0)
    logslopes = make_learned_logslopes(heads)
    logslopes = logslopes + 0.01 * jax.random.normal(key, logslopes.shape, jnp.float32)

    # 1) Tiny shape: pure-JAX fallback path (no pallas_call; XLA fuses it).
    i1, j1 = 8, 8
    out1 = jax.block_until_ready(learned_alibi_positional_bias(logslopes, i1, j1))
    ref1 = reference(logslopes, i1, j1)
    assert out1.shape == (heads, i1, j1), out1.shape
    assert jnp.allclose(out1, ref1, atol=1e-5, rtol=1e-5), float(
        jnp.max(jnp.abs(out1 - ref1))
    )

    # 2) Pallas tiled path (default tile selection -> TJ = j full rows, TI
    #    split to give >= 2 parallel blocks for megacore; heads innermost).
    i2, j2 = 64, 256
    out2 = jax.block_until_ready(
        learned_alibi_positional_bias(logslopes, i2, j2, jax_fallback_bytes=0)
    )
    ref2 = reference(logslopes, i2, j2)
    assert out2.shape == (heads, i2, j2), out2.shape
    assert jnp.allclose(out2, ref2, atol=1e-5, rtol=1e-5), float(
        jnp.max(jnp.abs(out2 - ref2))
    )

    # 3) Pallas tiled path with forced small blocks + ragged extents
    #    (exercises partial row/col tiles and the dist-slab reuse across heads).
    i3, j3 = 40, 200
    out3 = jax.block_until_ready(
        learned_alibi_positional_bias(
            logslopes, i3, j3, jax_fallback_bytes=0, block_budget_bytes=4096
        )
    )
    ref3 = reference(logslopes, i3, j3)
    assert out3.shape == (heads, i3, j3), out3.shape
    assert jnp.allclose(out3, ref3, atol=1e-5, rtol=1e-5), float(
        jnp.max(jnp.abs(out3 - ref3))
    )

    print("KERNEL_OK")
</pallas_src>

<mosaic_0001>
module attributes {stable_mosaic.version = 11 : i64} {
  func.func @_alibi_tiled_kernel(%arg0: i32, %arg1: i32, %arg2: i32, %arg3: memref<4xf32, #tpu.memory_space<smem>>, %arg4: memref<1x32x256xf32, #tpu.memory_space<vmem>>, %arg5: memref<1x32x256xf32, #tpu.memory_space<vmem>>) attributes {dimension_semantics = [#tpu.dimension_semantics<parallel>, #tpu.dimension_semantics<parallel>, #tpu.dimension_semantics<arbitrary>], iteration_bounds = array<i64: 2, 1, 4>, scalar_prefetch = 0 : i64, scratch_operands = 1 : i64, tpu.core_type = #tpu.core_type<tc>, window_params = [{transform_indices = @transform_0, window_bounds = array<i64: 4>}, {transform_indices = @transform_1, window_bounds = array<i64: 1, 32, 256>}]} {
    %c0_i32 = arith.constant 0 : i32
    %0 = arith.cmpi eq, %arg2, %c0_i32 : i32
    %1 = arith.extui %0 : i1 to i32
    %c0_i32_0 = arith.constant 0 : i32
    %2 = arith.cmpi ne, %1, %c0_i32_0 : i32
    scf.if %2 {
      %c256_i32 = arith.constant 256 : i32
      %9 = arith.muli %arg1, %c256_i32 : i32
      %c32_i32 = arith.constant 32 : i32
      %10 = arith.muli %arg0, %c32_i32 : i32
      %11 = arith.subi %9, %10 : i32
      %c192_i32 = arith.constant 192 : i32
      %12 = arith.subi %11, %c192_i32 : i32
      %13 = tpu.iota {dimensions = array<i32: 2>} : vector<1x32x256xi32>
      %14 = tpu.iota {dimensions = array<i32: 1>} : vector<1x32x256xi32>
      %15 = arith.subi %13, %14 : vector<1x32x256xi32>
      %16 = vector.broadcast %12 : i32 to vector<1x32x256xi32>
      %17 = arith.addi %15, %16 : vector<1x32x256xi32>
      %18 = math.absi %17 : vector<1x32x256xi32>
      %19 = arith.sitofp %18 : vector<1x32x256xi32> to vector<1x32x256xf32>
      %c0_6 = arith.constant 0 : index
      %c0_7 = arith.constant 0 : index
      %c0_8 = arith.constant 0 : index
      %20 = vector.load %arg5[%c0_6, %c0_7, %c0_8] : memref<1x32x256xf32, #tpu.memory_space<vmem>>, vector<1x32x256xf32>
      tpu.vector_store %arg5[%c0_6, %c0_7, %c0_8], %19 {strides = array<i32>} : memref<1x32x256xf32, #tpu.memory_space<vmem>>, vector<1x32x256xf32>,
    } else {
    }
    %c0 = arith.constant 0 : index
    %c0_1 = arith.constant 0 : index
    %c0_2 = arith.constant 0 : index
    %3 = vector.load %arg5[%c0, %c0_1, %c0_2] : memref<1x32x256xf32, #tpu.memory_space<vmem>>, vector<1x32x256xf32>
    %4 = arith.index_cast %arg2 : i32 to index
    %5 = memref.load %arg3[%4] : memref<4xf32, #tpu.memory_space<smem>>
    %6 = vector.broadcast %5 : f32 to vector<1x32x256xf32>
    %7 = arith.mulf %3, %6 : vector<1x32x256xf32>
    %c0_3 = arith.constant 0 : index
    %c0_4 = arith.constant 0 : index
    %c0_5 = arith.constant 0 : index
    %8 = vector.load %arg4[%c0_3, %c0_4, %c0_5] : memref<1x32x256xf32, #tpu.memory_space<vmem>>, vector<1x32x256xf32>
    tpu.vector_store %arg4[%c0_3, %c0_4, %c0_5], %7 {strides = array<i32>} : memref<1x32x256xf32, #tpu.memory_space<vmem>>, vector<1x32x256xf32>,
    return
  }
  func.func @transform_0(%arg0: i32, %arg1: i32, %arg2: i32) -> i32 {
    %c0_i32 = arith.constant 0 : i32
    %c0_i32_0 = arith.constant 0 : i32
    return %c0_i32 : i32
  }
  func.func @transform_1(%arg0: i32, %arg1: i32, %arg2: i32) -> (i32, i32, i32) {
    %c0_i32 = arith.constant 0 : i32
    return %arg2, %arg0, %arg1 : i32, i32, i32
  }
}

</mosaic_0001>

<bundles_post_ra>
// kernel: tpu_custom_call.1
= control target key start
LH: loop header
LB: loop body
LE: loop exit
PB: predicated region body
PF: predicated region fallthrough
CT: control target
= control target key end

     0   :  { %6 = vsyncpa [#allocation5], 0  ;;  %s749_s0 = inlined_call_operand.hbm [shape: f32[4], index: 0, kind: input, shape index: {}]   ;;  %s750_s1 = inlined_call_operand.hbm [shape: f32[4,64,256], index: 1, kind: output, shape index: {}]  }
   0x1   :  { %7 = vsyncpa [#allocation4], 0 }
   0x2   :  { %9 = vsyncpa [#allocation4 + $0x1], 0  ;;  %s568_s6 = smov 0   ;;  %s570_s7 = smov 0  }
   0x3   :  { %s572_s8 = smov 0   ;;  %s574_s9 = smov 0  }
   0x4   :  { %s576_s10 = smov 0   ;;  %s578_s11 = smov 0  }
   0x5   :  { %s580_s12 = smov 0   ;;  %s582_s13 = smov 0  }
   0x6 LB: > { %s331_s14 = sadd.s32 4294967295, %s552_s13   ;;  %s332_s15 = sadd.s32 4294967294, %s552_s13   ;;  %s552_s13 = sphi %s582_s13, %s15_s13   ;;  %s548_s12 = sphi %s580_s12, %s761_s12   ;;  %s544_s11 = sphi %s578_s11, %s760_s11   ;;  %s540_s10 = sphi %s576_s10, %s759_s10   ;;  %s536_s9 = sphi %s574_s9, %s758_s9   ;;  %s532_s8 = sphi %s572_s8, %s757_s8   ;;  %s528_s7 = sphi %s570_s7, %s756_s7   ;;  %s524_s6 = sphi %s568_s6, %s755_s6  }
   0x7   : > { %s27_s16 = sadd.s32 1, %s544_s11  ;;  %s34_s17 = sadd.s32 1, %s548_s12 }
   0x8   : > { %p28_p0 = scmp.ge.s32.totalorder %s27_s16, 4  ;;  %s66_s18 = sadd.s32 1, %s532_s8 }
   0x9   : > { %p76_p1 = scmp.ne.s32.totalorder %s532_s8, %s528_s7  ;;  %p77_p2 = scmp.eq.s32.totalorder %s331_s14, 7 }
   0xa   : > { %s763_s16 = smov (%p28_p0, %s27_s16), 0  ;;  %s765_s17 = smov (!%p28_p0, %s34_s17), %s548_s12 }
   0xb   : > { %s59_s19 = ssub.s32 %s544_s11, %s763_s16  ;;  %p620_p3 = por %p77_p2, %p76_p1 }
   0xc   : > { %p36_p4 = scmp.ge.s32.totalorder %s765_s17, 2  ;;  %p82_p5 = scmp.ne.s32.totalorder %s528_s7, %s524_s6 }
   0xd   : > { %p83_p6 = scmp.eq.s32.totalorder %s332_s15, 7  ;;  %p333_p7 = scmp.ge.s32.totalorder %s552_s13, 1 }
   0xe   : > { %s767_s17 = smov (%p36_p4, %s765_s17), 0  ;;  %p90_p9 = scmp.lt.s32.totalorder %s552_s13, 9 }
   0xf   : > { %p629_p8 = por %p83_p6, %p82_p5  ;;  %s60_s22 = ssub.s32 %s548_s12, %s767_s17 }
  0x10   : > { %s61_s23 = sor.u32 %s60_s22, %s59_s19  ;;  %p636_p10 = pnand %p333_p7, %p90_p9 }
  0x11   : > { %p64_p11 = scmp.eq.s32.totalorder %s61_s23, 0  ;;  %p640_p12 = scmp.eq.s32.totalorder %s331_s14, 0 }
  0x12   : > { %p363_p13 = pneg %p636_p10  ;;  %s441_s29 = scalar_lea.hbm %s749_s0, 16 }
  0x13   : > { %s647_s26 = scalar_select %p64_p11, %s532_s8, %s66_s18  }
  0x14   : > { %p364_p0 = pnand %p640_p12, %p363_p13  ;;  %p442_p1 = scmp.ne.s32.totalorder %s749_s0, %s441_s29 }
  0x15   : > { %p448_p6 = scmp.lt.u32.totalorder %s441_s29, %s749_s0 }
  0x16   : > { %p443_p2 = pneg %p364_p0 }
  0x18   : > { %p444_p4 = pnand %p443_p2, %p442_p1 }
  0x1a   : > { %p445_p5 = pneg %p444_p4 }
  0x1c   : > { %p450_p7 = pnand %p448_p6, %p445_p5 }
  0x1e   : > { %453 = shalt.err (!%p450_p7)
}
  0x1f   : > { %s554_s5 = smov [#allocation3]   ;;  %114 = sbr.rel (%p636_p10) target bundleno = 90 (0x5a), region = 24 }
  0x20   : > { %366 = dma.hbm_to_smem (!%p364_p0), %s749_s0, 16, %s554_s5, [#allocation5]  }
  0x26   : > { %515 = dma.done.wait (%p640_p12), [#allocation5], 16  }
  0x27   : > { %517 = vsyncadd (%p640_p12), [#allocation5], 4294967280 }
  0x28   : > { %120 = sfence }
  0x29   : > { %s127_s18 = sand.u32 1, %s528_s7   ;;  %p338_p9 = scmp.ne.s32.totalorder %s536_s9, 0 }
  0x2a   : > { %s337_s19 = sshll.u32 %s127_s18, 6  ;;  %s339_s23 = sshll.u32 (!%p338_p9), %s540_s10, 5  ;;  %v140_v0 = vlaneseq (!%p338_p9) }
  0x2b   : > { %s672_s22 = scalar_lea.vmem [#allocation6], %s337_s19  ;;  %135 = sbr.rel (%p338_p9) target bundleno = 62 (0x3e), region = 32 }
  0x2c   : > { %s138_s24 = ssub.s32 (!%p338_p9), 0, %s339_s23  ;;  %v141_v1 = vand.u32 (!%p338_p9), 127, %v140_v0  ;;  %v144_v2 = vshrl.u32 (!%p338_p9), %v140_v0, 7 }
  0x2d   : > { %s340_s27 = sadd.s32 (!%p338_p9), 4294967104, %s138_s24 }
  0x2e   : > { %v156_v3 = vstv (!%p338_p9), %s340_s27  ;;  %v148_v4 = vsub.s32 (!%p338_p9), %v141_v1, %v144_v2  ;;  %v142_v5 = vadd.s32 (!%p338_p9), 128, %v141_v1  ;;  %v145_v6 = vadd.s32 (!%p338_p9), 8, %v144_v2 }
  0x2f   : > { %v146_v7 = vadd.s32 (!%p338_p9), 16, %v144_v2  ;;  %v147_v8 = vadd.s32 (!%p338_p9), 24, %v144_v2 }
  0x30   : > { %v157_v9 = vadd.s32 (!%p338_p9), %v156_v3, %v148_v4  ;;  %v149_v10 = vsub.s32 (!%p338_p9), %v142_v5, %v144_v2  ;;  %v150_v11 = vsub.s32 (!%p338_p9), %v141_v1, %v145_v6  ;;  %v151_v12 = vsub.s32 (!%p338_p9), %v142_v5, %v145_v6 }
  0x31   : > { %v152_v13 = vsub.s32 (!%p338_p9), %v141_v1, %v146_v7  ;;  %v153_v14 = vsub.s32 (!%p338_p9), %v142_v5, %v146_v7  ;;  %v154_v15 = vsub.s32 (!%p338_p9), %v141_v1, %v147_v8  ;;  %v155_v16 = vsub.s32 (!%p338_p9), %v142_v5, %v147_v8 }
  0x32   : > { %v166_v17 = vsub.s32 0, %v157_v9  ;;  %v158_v18 = vadd.s32 %v156_v3, %v149_v10  ;;  %v159_v19 = vadd.s32 %v156_v3, %v150_v11  ;;  %v160_v20 = vadd.s32 %v156_v3, %v151_v12 }
  0x33   : > { %v161_v21 = vadd.s32 %v156_v3, %v152_v13  ;;  %v162_v22 = vadd.s32 %v156_v3, %v153_v14  ;;  %v163_v23 = vadd.s32 %v156_v3, %v154_v15  ;;  %v164_v24 = vadd.s32 %v156_v3, %v155_v16 }
  0x34   : > { %v341_v25 = vmin.u32 %v166_v17, %v157_v9  ;;  %v169_v26 = vsub.s32 0, %v158_v18  ;;  %v172_v27 = vsub.s32 0, %v159_v19  ;;  %v175_v28 = vsub.s32 0, %v160_v20 }
  0x35   : > { %v178_v29 = vsub.s32 0, %v161_v21  ;;  %v181_v30 = vsub.s32 0, %v162_v22  ;;  %v184_v31 = vsub.s32 0, %v163_v23  ;;  %v187_v32 = vsub.s32 0, %v164_v24 }
  0x36   : > { %v189_v33 = vcvt.s32.f32 %v341_v25  ;;  %v342_v34 = vmin.u32 %v169_v26, %v158_v18  ;;  %v343_v35 = vmin.u32 %v172_v27, %v159_v19  ;;  %v344_v36 = vmin.u32 %v175_v28, %v160_v20 }
  0x37   : > { %v345_v37 = vmin.u32 %v178_v29, %v161_v21  ;;  %v346_v38 = vmin.u32 %v181_v30, %v162_v22  ;;  %v347_v39 = vmin.u32 %v184_v31, %v163_v23  ;;  %v348_v40 = vmin.u32 %v187_v32, %v164_v24 }
  0x38   : > { %197 = vst [vmem:[#allocation2] sm:$0xff] %v189_v33  ;;  %v190_v41 = vcvt.s32.f32 %v342_v34  ;;  %v191_v42 = vcvt.s32.f32 %v343_v35  ;;  %v192_v43 = vcvt.s32.f32 %v344_v36 }
  0x39   : > { %v193_v44 = vcvt.s32.f32 %v345_v37  ;;  %v194_v45 = vcvt.s32.f32 %v346_v38  ;;  %v195_v46 = vcvt.s32.f32 %v347_v39  ;;  %v196_v47 = vcvt.s32.f32 %v348_v40 }
  0x3a   : > { %198 = vst [vmem:[#allocation2 + $0x8] sm:$0xff] %v190_v41  ;;  %199 = vst [vmem:[#allocation2 + $0x10] sm:$0xff] %v191_v42 }
  0x3b   : > { %200 = vst [vmem:[#allocation2 + $0x18] sm:$0xff] %v192_v43  ;;  %201 = vst [vmem:[#allocation2 + $0x20] sm:$0xff] %v193_v44 }
  0x3c   : > { %202 = vst [vmem:[#allocation2 + $0x28] sm:$0xff] %v194_v45  ;;  %203 = vst [vmem:[#allocation2 + $0x30] sm:$0xff] %v195_v46 }
  0x3d   : > { %204 = vst [vmem:[#allocation2 + $0x38] sm:$0xff] %v196_v47 }
  0x3e PF: > { %s213_s25 = sld [smem:[#allocation3 + %s536_s9]]  ;;  %s356_s28 = sshll.u32 %s540_s10, 3 }
  0x3f   : > { %s352_s29 = sshll.u32 %s536_s9, 4  ;;  %v205_v48 = vld [vmem:[#allocation2] sm:$0xff]  ;;  %s250_s3 = sshll.u32 %s672_s22, 4  ;;  %s685_s3 = int_to_ptr.vmem [resolvable:$true] %s250_s3 }
  0x40   : > { %s247_s30 = sadd.s32 %s356_s28, %s352_s29  ;;  %s697_s5 = scalar_lea.sflag [#allocation4], %s127_s18 }
  0x41   : > { %v206_v49 = vld [vmem:[#allocation2 + $0x8] sm:$0xff]  ;;  %v207_v50 = vld [vmem:[#allocation2 + $0x10] sm:$0xff]  ;;  %s353_s2 = sshll.u32 %s247_s30, 7  ;;  %s454_s14 = scalar_lea.vmem %s685_s3, 1024 }
  0x42   : > { %v208_v51 = vld [vmem:[#allocation2 + $0x18] sm:$0xff]  ;;  %v209_v52 = vld [vmem:[#allocation2 + $0x20] sm:$0xff]  ;;  %s683_s4 = scalar_lea.hbm %s750_s1, %s353_s2  ;;  %p455_p10 = scmp.ne.s32.totalorder %s685_s3, %s454_s14 }
  0x43   : > { %v210_v53 = vld [vmem:[#allocation2 + $0x28] sm:$0xff]  ;;  %v211_v54 = vld [vmem:[#allocation2 + $0x30] sm:$0xff]  ;;  %s555_s15 = smov [#allocation6]  }
  0x44   : > { %v212_v55 = vld [vmem:[#allocation2 + $0x38] sm:$0xff]  ;;  %v214_v56 = vstv %s213_s25  ;;  %p456_p11 = pnand %p455_p10, %p620_p3  ;;  %s458_s19 = sshll.u32 %s555_s15, 4  ;;  %s459_s19 = int_to_ptr.vmem [resolvable:$false] %s458_s19 }
  0x45   : > { %v215_v57 = vmul.f32 %v214_v56, %v205_v48  ;;  %v216_v58 = vmul.f32 %v214_v56, %v206_v49  ;;  %v217_v59 = vmul.f32 %v214_v56, %v207_v50  ;;  %v218_v60 = vmul.f32 %v214_v56, %v208_v51  ;;  %s460_s23 = scalar_lea.vmem %s459_s19, 2048  ;;  %p461_p13 = scmp.lt.s32.totalorder %s685_s3, %s459_s19 }
  0x46   : > { %v219_v61 = vmul.f32 %v214_v56, %v209_v52  ;;  %v220_v62 = vmul.f32 %v214_v56, %v210_v53  ;;  %v221_v63 = vmul.f32 %v214_v56, %v211_v54  ;;  %v222_v0 = vmul.f32 %v214_v56, %v212_v55  ;;  %p457_p12 = pneg %p456_p11  ;;  %p462_p0 = scmp.lt.s32.totalorder %s460_s23, %s454_s14 }
  0x47   : > { %223 = vst [vmem:[%s672_s22] sm:$0xff] %v215_v57  ;;  %224 = vst [vmem:[%s672_s22 + $0x8] sm:$0xff] %v216_v58 }
  0x48   : > { %225 = vst [vmem:[%s672_s22 + $0x10] sm:$0xff] %v217_v59  ;;  %226 = vst [vmem:[%s672_s22 + $0x18] sm:$0xff] %v218_v60  ;;  %p463_p1 = por %p462_p0, %p461_p13 }
  0x49   : > { %227 = vst [vmem:[%s672_s22 + $0x20] sm:$0xff] %v219_v61  ;;  %228 = vst [vmem:[%s672_s22 + $0x28] sm:$0xff] %v220_v62 }
  0x4a   : > { %229 = vst [vmem:[%s672_s22 + $0x30] sm:$0xff] %v221_v63  ;;  %230 = vst [vmem:[%s672_s22 + $0x38] sm:$0xff] %v222_v0  ;;  %p464_p2 = pnand %p463_p1, %p457_p12 }
  0x4c   : > { %467 = shalt.err (!%p464_p2)
}
  0x4d   : > { %s468_s18 = scalar_lea.hbm %s683_s4, 1024  ;;  %s472_s27 = scalar_lea.hbm %s750_s1, 8192 }
  0x4e   : > { %p469_p4 = scmp.ne.s32.totalorder %s683_s4, %s468_s18  ;;  %p473_p7 = scmp.lt.u32.totalorder %s683_s4, %s750_s1 }
  0x4f   : > { %p474_p9 = scmp.lt.u32.totalorder %s472_s27, %s468_s18  ;;  %p476_p11 = scmp.lt.u32.totalorder %s468_s18, %s683_s4 }
  0x50   : > { %p470_p5 = pnand %p469_p4, %p620_p3 }
  0x51   : > { %p475_p10 = por %p474_p9, %p473_p7 }
  0x52   : > { %p471_p6 = pneg %p470_p5 }
  0x53   : > { %p477_p12 = por %p476_p11, %p475_p10 }
  0x55   : > { %p478_p13 = pnand %p477_p12, %p471_p6 }
  0x57   : > { %481 = shalt.err (!%p478_p13)
}
  0x58   : > { %s556_s29 = smov 256   ;;  %s557_s30 = smov 16  }
  0x59   : > { %361 = dma.vmem_to_hbm [thread:$0]  (%p620_p3), %s685_s3, 1024, %s683_s4, %s697_s5, %s556_s29, %s556_s29, %s557_s30  }
  0x5a PF: > { %p373_p0 = scmp.ge.s32.totalorder %s552_s13, 2  ;;  %s265_s2 = sand.u32 1, %s524_s6  }
  0x5b   : > { %s266_s9 = scalar_lea.sflag [#allocation4], %s265_s2 }
  0x5c   : > { %p368_p1 = pnand %p373_p0, %p629_p8 }
  0x5e   : > { %519 = dma.done.wait (!%p368_p1), %s266_s9, 1024  }
  0x5f   : > { %521 = vsyncadd (!%p368_p1), %s266_s9, 4294966272  ;;  %s15_s13 = sadd.s32 1, %s552_s13   ;;  %s755_s6 = smov %s528_s7 }
  0x60   : > { %p12_p2 = scmp.ge.s32.totalorder %s15_s13, 10   ;;  %s756_s7 = smov %s532_s8 }
  0x61   : > { %s757_s8 = smov %s647_s26  ;;  %s758_s9 = smov %s544_s11 }
  0x62   : > { %s759_s10 = smov %s548_s12  ;;  %s760_s11 = smov %s763_s16 }
  0x63   : > { %s761_s12 = smov %s767_s17  ;;  %14 = sbr.rel (!%p12_p2) target bundleno = 6 (0x6), region = 65 }
  0x6a   :  { %271 = vsyncpa [#allocation4], 1 }
  0x6b   :  { %273 = vsyncpa [#allocation4 + $0x1], 1 }
  0x6c   :  { %274 = vsyncpa [#allocation5], 1 }
  0x6d   :  { %276 = vsyncpa [#allocation5 + $0x1], 1 }

</bundles_post_ra>
